<compile_context>
chip_gen: v6e
topology: v6e:2x2x1
jax: 0.10.0
libtpu: 0.0.40
codegen_flags: <defaults>
</compile_context>

<pallas_src>
import jax
import jax.numpy as jnp
from jax import lax
from jax.experimental import pallas as pl
from jax.experimental.pallas import tpu as pltpu

# ----- configuration (mirrors the shapes implied by TextCNN.__init__) --------
V = 50            # args.embed_num
D = 16            # args.embed_dim
C = 5             # args.class_num
CO = 4            # args.kernel_num
KS = (3, 4, 5)    # args.kernel_sizes
PAD_ID = 0
D_MODEL = len(KS) * CO   # 12 = d_model of SentenceEncoder
HEADS = 3                # -> d_k = 4 (d_model divisible by heads)
D_FF = 4
EPS = 1e-6
NEG_BIG = -1e30
N_BATCH = 2
SEQ = 8

VMEM_SPEC = pl.BlockSpec(memory_space=pltpu.MemorySpace.VMEM)


# ----------------------------- fused Pallas kernel ---------------------------
def _textcnn_fused_kernel(tok_ref, t_ref, bmask_ref,
                          n1a_ref, n1b_ref, wvo_ref, bvo_ref,
                          n2a_ref, n2b_ref, w1_ref, b1_ref, w2_ref, b2_ref,
                          nfa_ref, nfb_ref, wfc_ref, bfc_ref,
                          out_ref):
    """Entire TextCNN forward (post token ids) in one kernel.

    tok_ref:   (N*W, 1) int32 token ids, flattened row-major
    t_ref:     (V, Kmax*M)  embedding table pre-multiplied by each conv tap
               (tap-major column blocks of width M = len(KS)*Co; zero columns
               for taps >= K of a branch)
    bmask_ref: (W, M)  conv bias where position t is valid for the branch,
               -1e30 where it is not (masks wrapped / out-of-range rows)
    out_ref:   (N*N, C) logits (row i*N+j == reference logit[i, j, :])
    """
    NW = tok_ref.shape[0]
    Vv = t_ref.shape[0]
    W = bmask_ref.shape[0]
    M = bmask_ref.shape[1]
    Kmax = t_ref.shape[1] // M
    N = NW // W

    # ---- embedding gather + every conv tap as ONE one-hot MXU matmul --------
    onehot = (tok_ref[...] ==
              lax.broadcasted_iota(jnp.int32, (NW, Vv), 1)).astype(jnp.float32)
    taps = jnp.dot(onehot, t_ref[...],
                   preferred_element_type=jnp.float32)         # (N*W, Kmax*M)

    # ---- conv = sum of sublane-rolled per-tap blocks; mask; pool; ReLU ------
    conv = taps[:, :M]
    for k in range(1, Kmax):
        # row t picks up row t+k of tap-k's block (rotation; wrapped rows land
        # only on positions already masked to -1e30 by bmask)
        conv = conv + pltpu.roll(taps[:, k * M:(k + 1) * M],
                                 shift=NW - k, axis=0)
    conv = conv.reshape(N, W, M) + bmask_ref[...]               # bias / -1e30 mask
    feat = jnp.maximum(jnp.max(conv, axis=1), 0.0)              # (N, M)

    def norm(x, a, b):
        # alpha * (x - mean) / (std + eps) + bias, torch's unbiased std (ddof=1)
        m = jnp.mean(x, axis=-1, keepdims=True)
        xc = x - m
        var = jnp.sum(xc * xc, axis=-1, keepdims=True) * (1.0 / (x.shape[-1] - 1))
        inv = pl.reciprocal(jnp.sqrt(var) + EPS, approx=True)   # EUP slot, not VALU divide
        return a * xc * inv + b

    # ---- EncoderLayer (1 layer, heads=3) + final Norm + fc1 -----------------
    # TODO(synk): the reference attention sees a length-1 key/value "sequence"
    # (the pooled features), so the masked softmax weight is exactly 1 and
    # attention(q, k, v) collapses to `v`; q/k projections and the pad mask
    # cannot affect the output.  We implement that collapsed form, with
    # v_linear and attn.out folded into Wvo/bvo at pack time.
    x2 = norm(feat, n1a_ref[...], n1b_ref[...])                          # norm_1
    attn = jnp.dot(x2, wvo_ref[...],
                   preferred_element_type=jnp.float32) + bvo_ref[...]    # (N, M)
    # reference residual: (N, M) + (N, 1, M) broadcasts to (N, N, M); row-major
    # flatten so row i*N + j = attn[i] + feat[j].
    xf = (attn[:, None, :] + feat[None, :, :]).reshape(N * N, M)
    x2 = norm(xf, n2a_ref[...], n2b_ref[...])                            # norm_2
    h = jnp.maximum(jnp.dot(x2, w1_ref[...],
                            preferred_element_type=jnp.float32) + b1_ref[...], 0.0)
    ff = jnp.dot(h, w2_ref[...],
                 preferred_element_type=jnp.float32) + b2_ref[...]       # FeedForward
    xf = xf + ff                                                         # residual
    xn = norm(xf, nfa_ref[...], nfb_ref[...])                            # final Norm
    out_ref[...] = (jnp.dot(xn, wfc_ref[...],
                            preferred_element_type=jnp.float32) + bfc_ref[...])


# ----------------------------- parameters ------------------------------------
def init_params(key):
    keys = jax.random.split(key, 16)
    p = {}
    p["embed"] = jax.random.normal(keys[0], (V, D), jnp.float32)        # nn.Embedding(V, D)
    p["conv_w"], p["conv_b"] = [], []
    for i, K in enumerate(KS):                                          # nn.Conv2d(1, Co, (K, D))
        p["conv_w"].append(0.1 * jax.random.normal(keys[1 + i], (K, D, CO), jnp.float32))
        p["conv_b"].append(0.01 * (i + 1) * jnp.ones((1, CO), jnp.float32))

    def lin(k, din, dout):
        return (0.1 * jax.random.normal(k, (din, dout), jnp.float32),
                jnp.zeros((1, dout), jnp.float32))

    # SentenceEncoder(d_model=12, N=1, heads=3)
    p["n1_a"], p["n1_b"] = jnp.ones((1, D_MODEL), jnp.float32), jnp.zeros((1, D_MODEL), jnp.float32)
    p["n2_a"], p["n2_b"] = jnp.ones((1, D_MODEL), jnp.float32), jnp.zeros((1, D_MODEL), jnp.float32)
    p["nf_a"], p["nf_b"] = jnp.ones((1, D_MODEL), jnp.float32), jnp.zeros((1, D_MODEL), jnp.float32)
    p["Wq"], p["bq"] = lin(keys[4], D_MODEL, D_MODEL)   # present in module; inert in this forward
    p["Wk"], p["bk"] = lin(keys[5], D_MODEL, D_MODEL)   # present in module; inert in this forward
    p["Wv"], p["bv"] = lin(keys[6], D_MODEL, D_MODEL)
    p["Wo"], p["bo"] = lin(keys[7], D_MODEL, D_MODEL)
    p["W1"], p["b1"] = lin(keys[8], D_MODEL, D_FF)      # FeedForward.linear_1
    p["W2"], p["b2"] = lin(keys[9], D_FF, D_MODEL)      # FeedForward.linear_2
    p["Wfc"], p["bfc"] = lin(keys[10], D_MODEL, C)      # fc1
    return p


def pack_params(p, W):
    """One-time packing: fold the embedding into every conv tap (T), build the
    per-branch valid-position bias/mask, fold Wv@Wo."""
    Kmax = max(KS)
    t = jnp.arange(W)[:, None]                                    # (W, 1)
    tap_blocks, b_rows = [], []
    for k in range(Kmax):
        cols = []
        for K, w in zip(KS, p["conv_w"]):                         # w: (K, D, Co)
            if k < K:
                cols.append(p["embed"] @ w[k])                    # (V, Co)
            else:
                cols.append(jnp.zeros((V, CO), jnp.float32))      # dead tap for this branch
        tap_blocks.append(jnp.concatenate(cols, axis=1))          # (V, M)
    for K, b in zip(KS, p["conv_b"]):
        b_rows.append(jnp.where(t < (W - K + 1), b, NEG_BIG))     # (W, Co)
    T = jnp.concatenate(tap_blocks, axis=1)                       # (V, Kmax*M)
    bmask = jnp.concatenate(b_rows, axis=1)                       # (W, M)
    wvo = p["Wv"] @ p["Wo"]                                       # attention collapses to v,
    bvo = p["bv"] @ p["Wo"] + p["bo"]                             # so v_linear∘out == one linear
    return (T, bmask,
            p["n1_a"], p["n1_b"], wvo, bvo,
            p["n2_a"], p["n2_b"], p["W1"], p["b1"], p["W2"], p["b2"],
            p["nf_a"], p["nf_b"], p["Wfc"], p["bfc"])


# ----------------------------- forward pass ----------------------------------
def textcnn_forward(tokens, packed):
    # create_mask(x, pad_id) is dead in the collapsed attention (see TODO in
    # the kernel) and is intentionally not computed; dropout layers are
    # identity at inference.
    # TODO(synk): at real batch sizes, add a leading grid axis over sentence
    # groups with dimension_semantics=("parallel",) to use both v7x TensorCores.
    n, w = tokens.shape
    tok_flat = tokens.reshape(n * w, 1).astype(jnp.int32)
    flat = pl.pallas_call(
        _textcnn_fused_kernel,
        out_shape=jax.ShapeDtypeStruct((n * n, C), jnp.float32),
        in_specs=[VMEM_SPEC] * (1 + len(packed)),
        out_specs=VMEM_SPEC,
    )(tok_flat, *packed)
    return flat.reshape(n, n, C)


if __name__ == "__main__":
    key = jax.random.PRNGKey(0)
    pkey, xkey = jax.random.split(key)
    params = init_params(pkey)
    packed = pack_params(params, SEQ)

    tokens = jax.random.randint(xkey, (N_BATCH, SEQ), 0, V, dtype=jnp.int32)
    tokens = tokens.at[:, -2:].set(PAD_ID)     # include some padding positions

    logits = jax.jit(textcnn_forward)(tokens, packed)
    jax.block_until_ready(logits)
    assert logits.shape == (N_BATCH, N_BATCH, C)
    assert logits.dtype == jnp.float32
    print("KERNEL_OK")
</pallas_src>

<mosaic_0001>
module attributes {stable_mosaic.version = 11 : i64} {
  func.func @_textcnn_fused_kernel(%arg0: memref<16x1xi32, #tpu.memory_space<vmem>>, %arg1: memref<50x60xf32, #tpu.memory_space<vmem>>, %arg2: memref<8x12xf32, #tpu.memory_space<vmem>>, %arg3: memref<1x12xf32, #tpu.memory_space<vmem>>, %arg4: memref<1x12xf32, #tpu.memory_space<vmem>>, %arg5: memref<12x12xf32, #tpu.memory_space<vmem>>, %arg6: memref<1x12xf32, #tpu.memory_space<vmem>>, %arg7: memref<1x12xf32, #tpu.memory_space<vmem>>, %arg8: memref<1x12xf32, #tpu.memory_space<vmem>>, %arg9: memref<12x4xf32, #tpu.memory_space<vmem>>, %arg10: memref<1x4xf32, #tpu.memory_space<vmem>>, %arg11: memref<4x12xf32, #tpu.memory_space<vmem>>, %arg12: memref<1x12xf32, #tpu.memory_space<vmem>>, %arg13: memref<1x12xf32, #tpu.memory_space<vmem>>, %arg14: memref<1x12xf32, #tpu.memory_space<vmem>>, %arg15: memref<12x5xf32, #tpu.memory_space<vmem>>, %arg16: memref<1x5xf32, #tpu.memory_space<vmem>>, %arg17: memref<4x5xf32, #tpu.memory_space<vmem>>) attributes {dimension_semantics = [], scalar_prefetch = 0 : i64, scratch_operands = 0 : i64, tpu.core_type = #tpu.core_type<tc>} {
    %c0 = arith.constant 0 : index
    %c0_0 = arith.constant 0 : index
    %0 = vector.load %arg0[%c0, %c0_0] : memref<16x1xi32, #tpu.memory_space<vmem>>, vector<16x1xi32>
    %1 = tpu.iota {dimensions = array<i32: 1>} : vector<16x50xi32>
    %2 = vector.broadcast %0 : vector<16x1xi32> to vector<16x50xi32>
    %3 = arith.cmpi eq, %2, %1 : vector<16x50xi32>
    %4 = arith.extui %3 : vector<16x50xi1> to vector<16x50xi32>
    %5 = arith.sitofp %4 : vector<16x50xi32> to vector<16x50xf32>
    %c0_1 = arith.constant 0 : index
    %c0_2 = arith.constant 0 : index
    %6 = vector.load %arg1[%c0_1, %c0_2] : memref<50x60xf32, #tpu.memory_space<vmem>>, vector<50x60xf32>
    %cst = arith.constant dense<0.000000e+00> : vector<16x60xf32>
    %7 = tpu.matmul %5, %6, %cst {dimension_numbers = #tpu.dot_dimension_numbers<[1], [0], [0], [1], [0, 0, 1, 1], [], []>} : vector<16x50xf32>, vector<50x60xf32>, vector<16x60xf32> -> vector<16x60xf32>
    %8 = vector.extract_strided_slice %7 {offsets = [0, 0], sizes = [16, 12], strides = [1, 1]} : vector<16x60xf32> to vector<16x12xf32>
    %9 = vector.extract_strided_slice %7 {offsets = [0, 12], sizes = [16, 12], strides = [1, 1]} : vector<16x60xf32> to vector<16x12xf32>
    %c15_i32 = arith.constant 15 : i32
    %10 = tpu.dynamic_rotate %9 by %c15_i32 dim 0 : vector<16x12xf32>, i32 -> vector<16x12xf32>
    %11 = arith.addf %8, %10 : vector<16x12xf32>
    %12 = vector.extract_strided_slice %7 {offsets = [0, 24], sizes = [16, 12], strides = [1, 1]} : vector<16x60xf32> to vector<16x12xf32>
    %c14_i32 = arith.constant 14 : i32
    %13 = tpu.dynamic_rotate %12 by %c14_i32 dim 0 : vector<16x12xf32>, i32 -> vector<16x12xf32>
    %14 = arith.addf %11, %13 : vector<16x12xf32>
    %15 = vector.extract_strided_slice %7 {offsets = [0, 36], sizes = [16, 12], strides = [1, 1]} : vector<16x60xf32> to vector<16x12xf32>
    %c13_i32 = arith.constant 13 : i32
    %16 = tpu.dynamic_rotate %15 by %c13_i32 dim 0 : vector<16x12xf32>, i32 -> vector<16x12xf32>
    %17 = arith.addf %14, %16 : vector<16x12xf32>
    %18 = vector.extract_strided_slice %7 {offsets = [0, 48], sizes = [16, 12], strides = [1, 1]} : vector<16x60xf32> to vector<16x12xf32>
    %c12_i32 = arith.constant 12 : i32
    %19 = tpu.dynamic_rotate %18 by %c12_i32 dim 0 : vector<16x12xf32>, i32 -> vector<16x12xf32>
    %20 = arith.addf %17, %19 : vector<16x12xf32>
    %21 = vector.shape_cast %20 : vector<16x12xf32> to vector<2x8x12xf32>
    %c0_3 = arith.constant 0 : index
    %c0_4 = arith.constant 0 : index
    %22 = vector.load %arg2[%c0_3, %c0_4] : memref<8x12xf32, #tpu.memory_space<vmem>>, vector<8x12xf32>
    %23 = vector.shape_cast %22 : vector<8x12xf32> to vector<1x8x12xf32>
    %24 = vector.broadcast %23 : vector<1x8x12xf32> to vector<2x8x12xf32>
    %25 = arith.addf %21, %24 : vector<2x8x12xf32>
    %cst_5 = arith.constant dense<0xFF800000> : vector<2x12xf32>
    %26 = vector.multi_reduction <maximumf>, %25, %cst_5 [1] : vector<2x8x12xf32> to vector<2x12xf32>
    %cst_6 = arith.constant 0.000000e+00 : f32
    %27 = vector.broadcast %cst_6 : f32 to vector<2x12xf32>
    %28 = arith.maximumf %26, %27 : vector<2x12xf32>
    %c0_7 = arith.constant 0 : index
    %c0_8 = arith.constant 0 : index
    %29 = vector.load %arg3[%c0_7, %c0_8] : memref<1x12xf32, #tpu.memory_space<vmem>>, vector<1x12xf32>
    %c0_9 = arith.constant 0 : index
    %c0_10 = arith.constant 0 : index
    %30 = vector.load %arg4[%c0_9, %c0_10] : memref<1x12xf32, #tpu.memory_space<vmem>>, vector<1x12xf32>
    %cst_11 = arith.constant dense<0.000000e+00> : vector<2xf32>
    %31 = vector.multi_reduction <add>, %28, %cst_11 [1] : vector<2x12xf32> to vector<2xf32>
    %32 = vector.shape_cast %31 : vector<2xf32> to vector<2x1xf32>
    %cst_12 = arith.constant 1.200000e+01 : f32
    %33 = vector.broadcast %cst_12 : f32 to vector<2x1xf32>
    %34 = arith.divf %32, %33 : vector<2x1xf32>
    %35 = vector.broadcast %34 : vector<2x1xf32> to vector<2x12xf32>
    %36 = arith.subf %28, %35 : vector<2x12xf32>
    %37 = arith.mulf %36, %36 : vector<2x12xf32>
    %cst_13 = arith.constant dense<0.000000e+00> : vector<2xf32>
    %38 = vector.multi_reduction <add>, %37, %cst_13 [1] : vector<2x12xf32> to vector<2xf32>
    %39 = vector.shape_cast %38 : vector<2xf32> to vector<2x1xf32>
    %cst_14 = arith.constant 0.0909090936 : f32
    %40 = vector.broadcast %cst_14 : f32 to vector<2x1xf32>
    %41 = arith.mulf %39, %40 : vector<2x1xf32>
    %42 = math.sqrt %41 : vector<2x1xf32>
    %cst_15 = arith.constant 9.99999997E-7 : f32
    %43 = vector.broadcast %cst_15 : f32 to vector<2x1xf32>
    %44 = arith.addf %42, %43 : vector<2x1xf32>
    %45 = tpu.reciprocal %44 {approx = true} : vector<2x1xf32> -> vector<2x1xf32>
    %46 = vector.broadcast %29 : vector<1x12xf32> to vector<2x12xf32>
    %47 = arith.mulf %46, %36 : vector<2x12xf32>
    %48 = vector.broadcast %45 : vector<2x1xf32> to vector<2x12xf32>
    %49 = arith.mulf %47, %48 : vector<2x12xf32>
    %50 = vector.broadcast %30 : vector<1x12xf32> to vector<2x12xf32>
    %51 = arith.addf %49, %50 : vector<2x12xf32>
    %c0_16 = arith.constant 0 : index
    %c0_17 = arith.constant 0 : index
    %52 = vector.load %arg5[%c0_16, %c0_17] : memref<12x12xf32, #tpu.memory_space<vmem>>, vector<12x12xf32>
    %cst_18 = arith.constant dense<0.000000e+00> : vector<2x12xf32>
    %53 = tpu.matmul %51, %52, %cst_18 {dimension_numbers = #tpu.dot_dimension_numbers<[1], [0], [0], [1], [0, 0, 1, 1], [], []>} : vector<2x12xf32>, vector<12x12xf32>, vector<2x12xf32> -> vector<2x12xf32>
    %c0_19 = arith.constant 0 : index
    %c0_20 = arith.constant 0 : index
    %54 = vector.load %arg6[%c0_19, %c0_20] : memref<1x12xf32, #tpu.memory_space<vmem>>, vector<1x12xf32>
    %55 = vector.broadcast %54 : vector<1x12xf32> to vector<2x12xf32>
    %56 = arith.addf %53, %55 : vector<2x12xf32>
    %57 = vector.shape_cast %56 : vector<2x12xf32> to vector<2x1x12xf32>
    %58 = vector.shape_cast %28 : vector<2x12xf32> to vector<1x2x12xf32>
    %59 = vector.broadcast %57 : vector<2x1x12xf32> to vector<2x2x12xf32>
    %60 = vector.broadcast %58 : vector<1x2x12xf32> to vector<2x2x12xf32>
    %61 = arith.addf %59, %60 : vector<2x2x12xf32>
    %62 = vector.shape_cast %61 : vector<2x2x12xf32> to vector<4x12xf32>
    %c0_21 = arith.constant 0 : index
    %c0_22 = arith.constant 0 : index
    %63 = vector.load %arg7[%c0_21, %c0_22] : memref<1x12xf32, #tpu.memory_space<vmem>>, vector<1x12xf32>
    %c0_23 = arith.constant 0 : index
    %c0_24 = arith.constant 0 : index
    %64 = vector.load %arg8[%c0_23, %c0_24] : memref<1x12xf32, #tpu.memory_space<vmem>>, vector<1x12xf32>
    %cst_25 = arith.constant dense<0.000000e+00> : vector<4xf32>
    %65 = vector.multi_reduction <add>, %62, %cst_25 [1] : vector<4x12xf32> to vector<4xf32>
    %66 = vector.shape_cast %65 : vector<4xf32> to vector<4x1xf32>
    %cst_26 = arith.constant 1.200000e+01 : f32
    %67 = vector.broadcast %cst_26 : f32 to vector<4x1xf32>
    %68 = arith.divf %66, %67 : vector<4x1xf32>
    %69 = vector.broadcast %68 : vector<4x1xf32> to vector<4x12xf32>
    %70 = arith.subf %62, %69 : vector<4x12xf32>
    %71 = arith.mulf %70, %70 : vector<4x12xf32>
    %cst_27 = arith.constant dense<0.000000e+00> : vector<4xf32>
    %72 = vector.multi_reduction <add>, %71, %cst_27 [1] : vector<4x12xf32> to vector<4xf32>
    %73 = vector.shape_cast %72 : vector<4xf32> to vector<4x1xf32>
    %cst_28 = arith.constant 0.0909090936 : f32
    %74 = vector.broadcast %cst_28 : f32 to vector<4x1xf32>
    %75 = arith.mulf %73, %74 : vector<4x1xf32>
    %76 = math.sqrt %75 : vector<4x1xf32>
    %cst_29 = arith.constant 9.99999997E-7 : f32
    %77 = vector.broadcast %cst_29 : f32 to vector<4x1xf32>
    %78 = arith.addf %76, %77 : vector<4x1xf32>
    %79 = tpu.reciprocal %78 {approx = true} : vector<4x1xf32> -> vector<4x1xf32>
    %80 = vector.broadcast %63 : vector<1x12xf32> to vector<4x12xf32>
    %81 = arith.mulf %80, %70 : vector<4x12xf32>
    %82 = vector.broadcast %79 : vector<4x1xf32> to vector<4x12xf32>
    %83 = arith.mulf %81, %82 : vector<4x12xf32>
    %84 = vector.broadcast %64 : vector<1x12xf32> to vector<4x12xf32>
    %85 = arith.addf %83, %84 : vector<4x12xf32>
    %c0_30 = arith.constant 0 : index
    %c0_31 = arith.constant 0 : index
    %86 = vector.load %arg9[%c0_30, %c0_31] : memref<12x4xf32, #tpu.memory_space<vmem>>, vector<12x4xf32>
    %cst_32 = arith.constant dense<0.000000e+00> : vector<4x4xf32>
    %87 = tpu.matmul %85, %86, %cst_32 {dimension_numbers = #tpu.dot_dimension_numbers<[1], [0], [0], [1], [0, 0, 1, 1], [], []>} : vector<4x12xf32>, vector<12x4xf32>, vector<4x4xf32> -> vector<4x4xf32>
    %c0_33 = arith.constant 0 : index
    %c0_34 = arith.constant 0 : index
    %88 = vector.load %arg10[%c0_33, %c0_34] : memref<1x4xf32, #tpu.memory_space<vmem>>, vector<1x4xf32>
    %89 = vector.broadcast %88 : vector<1x4xf32> to vector<4x4xf32>
    %90 = arith.addf %87, %89 : vector<4x4xf32>
    %cst_35 = arith.constant 0.000000e+00 : f32
    %91 = vector.broadcast %cst_35 : f32 to vector<4x4xf32>
    %92 = arith.maximumf %90, %91 : vector<4x4xf32>
    %c0_36 = arith.constant 0 : index
    %c0_37 = arith.constant 0 : index
    %93 = vector.load %arg11[%c0_36, %c0_37] : memref<4x12xf32, #tpu.memory_space<vmem>>, vector<4x12xf32>
    %cst_38 = arith.constant dense<0.000000e+00> : vector<4x12xf32>
    %94 = tpu.matmul %92, %93, %cst_38 {dimension_numbers = #tpu.dot_dimension_numbers<[1], [0], [0], [1], [0, 0, 1, 1], [], []>} : vector<4x4xf32>, vector<4x12xf32>, vector<4x12xf32> -> vector<4x12xf32>
    %c0_39 = arith.constant 0 : index
    %c0_40 = arith.constant 0 : index
    %95 = vector.load %arg12[%c0_39, %c0_40] : memref<1x12xf32, #tpu.memory_space<vmem>>, vector<1x12xf32>
    %96 = vector.broadcast %95 : vector<1x12xf32> to vector<4x12xf32>
    %97 = arith.addf %94, %96 : vector<4x12xf32>
    %98 = arith.addf %62, %97 : vector<4x12xf32>
    %c0_41 = arith.constant 0 : index
    %c0_42 = arith.constant 0 : index
    %99 = vector.load %arg13[%c0_41, %c0_42] : memref<1x12xf32, #tpu.memory_space<vmem>>, vector<1x12xf32>
    %c0_43 = arith.constant 0 : index
    %c0_44 = arith.constant 0 : index
    %100 = vector.load %arg14[%c0_43, %c0_44] : memref<1x12xf32, #tpu.memory_space<vmem>>, vector<1x12xf32>
    %cst_45 = arith.constant dense<0.000000e+00> : vector<4xf32>
    %101 = vector.multi_reduction <add>, %98, %cst_45 [1] : vector<4x12xf32> to vector<4xf32>
    %102 = vector.shape_cast %101 : vector<4xf32> to vector<4x1xf32>
    %cst_46 = arith.constant 1.200000e+01 : f32
    %103 = vector.broadcast %cst_46 : f32 to vector<4x1xf32>
    %104 = arith.divf %102, %103 : vector<4x1xf32>
    %105 = vector.broadcast %104 : vector<4x1xf32> to vector<4x12xf32>
    %106 = arith.subf %98, %105 : vector<4x12xf32>
    %107 = arith.mulf %106, %106 : vector<4x12xf32>
    %cst_47 = arith.constant dense<0.000000e+00> : vector<4xf32>
    %108 = vector.multi_reduction <add>, %107, %cst_47 [1] : vector<4x12xf32> to vector<4xf32>
    %109 = vector.shape_cast %108 : vector<4xf32> to vector<4x1xf32>
    %cst_48 = arith.constant 0.0909090936 : f32
    %110 = vector.broadcast %cst_48 : f32 to vector<4x1xf32>
    %111 = arith.mulf %109, %110 : vector<4x1xf32>
    %112 = math.sqrt %111 : vector<4x1xf32>
    %cst_49 = arith.constant 9.99999997E-7 : f32
    %113 = vector.broadcast %cst_49 : f32 to vector<4x1xf32>
    %114 = arith.addf %112, %113 : vector<4x1xf32>
    %115 = tpu.reciprocal %114 {approx = true} : vector<4x1xf32> -> vector<4x1xf32>
    %116 = vector.broadcast %99 : vector<1x12xf32> to vector<4x12xf32>
    %117 = arith.mulf %116, %106 : vector<4x12xf32>
    %118 = vector.broadcast %115 : vector<4x1xf32> to vector<4x12xf32>
    %119 = arith.mulf %117, %118 : vector<4x12xf32>
    %120 = vector.broadcast %100 : vector<1x12xf32> to vector<4x12xf32>
    %121 = arith.addf %119, %120 : vector<4x12xf32>
    %c0_50 = arith.constant 0 : index
    %c0_51 = arith.constant 0 : index
    %122 = vector.load %arg15[%c0_50, %c0_51] : memref<12x5xf32, #tpu.memory_space<vmem>>, vector<12x5xf32>
    %cst_52 = arith.constant dense<0.000000e+00> : vector<4x5xf32>
    %123 = tpu.matmul %121, %122, %cst_52 {dimension_numbers = #tpu.dot_dimension_numbers<[1], [0], [0], [1], [0, 0, 1, 1], [], []>} : vector<4x12xf32>, vector<12x5xf32>, vector<4x5xf32> -> vector<4x5xf32>
    %c0_53 = arith.constant 0 : index
    %c0_54 = arith.constant 0 : index
    %124 = vector.load %arg16[%c0_53, %c0_54] : memref<1x5xf32, #tpu.memory_space<vmem>>, vector<1x5xf32>
    %125 = vector.broadcast %124 : vector<1x5xf32> to vector<4x5xf32>
    %126 = arith.addf %123, %125 : vector<4x5xf32>
    %c0_55 = arith.constant 0 : index
    %c0_56 = arith.constant 0 : index
    %127 = vector.load %arg17[%c0_55, %c0_56] : memref<4x5xf32, #tpu.memory_space<vmem>>, vector<4x5xf32>
    tpu.vector_store %arg17[%c0_55, %c0_56], %126 {strides = array<i32>} : memref<4x5xf32, #tpu.memory_space<vmem>>, vector<4x5xf32>,
    return
  }
}

</mosaic_0001>

<bundles_post_ra>
// kernel: textcnn_forward.1
= control target key start
LH: loop header
LB: loop body
LE: loop exit
PB: predicated region body
PF: predicated region fallthrough
CT: control target
= control target key end

     0   :  { %s1459_s0 = inlined_call_operand.vmem [shape: s32[16,1], index: 0, kind: input, shape index: {}]   ;;  %s1460_s1 = inlined_call_operand.vmem [shape: f32[50,60], index: 1, kind: input, shape index: {}]   ;;  %s1461_s2 = inlined_call_operand.hbm [shape: f32[8,12], index: 2, kind: input, shape index: {}]   ;;  %s1462_s3 = inlined_call_operand.hbm [shape: f32[1,12], index: 3, kind: input, shape index: {}]   ;;  %s1463_s4 = inlined_call_operand.hbm [shape: f32[1,12], index: 4, kind: input, shape index: {}]   ;;  %s1464_s5 = inlined_call_operand.hbm [shape: f32[12,12], index: 5, kind: input, shape index: {}]   ;;  %s1465_s6 = inlined_call_operand.hbm [shape: f32[1,12], index: 6, kind: input, shape index: {}]   ;;  %s1466_s7 = inlined_call_operand.vmem [shape: f32[1,12], index: 7, kind: input, shape index: {}]   ;;  %s1467_s8 = inlined_call_operand.vmem [shape: f32[1,12], index: 8, kind: input, shape index: {}]   ;;  %s1468_s9 = inlined_call_operand.vmem [shape: f32[12,4], index: 9, kind: input, shape index: {}]   ;;  %s1469_s10 = inlined_call_operand.vmem [shape: f32[1,4], index: 10, kind: input, shape index: {}]   ;;  %s1470_s11 = inlined_call_operand.vmem [shape: f32[4,12], index: 11, kind: input, shape index: {}]   ;;  %s1471_s12 = inlined_call_operand.vmem [shape: f32[1,12], index: 12, kind: input, shape index: {}]   ;;  %s1472_s13 = inlined_call_operand.vmem [shape: f32[1,12], index: 13, kind: input, shape index: {}]   ;;  %s1473_s14 = inlined_call_operand.vmem [shape: f32[1,12], index: 14, kind: input, shape index: {}]   ;;  %s1474_s15 = inlined_call_operand.vmem [shape: f32[12,5], index: 15, kind: input, shape index: {}]   ;;  %s1475_s16 = inlined_call_operand.vmem [shape: f32[1,5], index: 16, kind: input, shape index: {}]   ;;  %s1476_s17 = inlined_call_operand.hbm [shape: f32[4,5], index: 17, kind: output, shape index: {}]  }
   0x1   :  { %1479 = sst [smem:[#allocation16_spill]] %s1459_s0 }
   0x2   :  { %1480 = sst [smem:[#allocation17_spill]] %s1460_s1 }
   0x3   :  { %22 = vsyncpa [#allocation3], 0 }
   0x4   :  { %23 = vsyncpa [#allocation6], 0 }
   0x5   :  { %24 = vsyncpa [#allocation9], 0 }
   0x6   :  { %25 = vsyncpa [#allocation4], 0  ;;  %s1193_s24 = smov [#allocation5]   ;;  %s1194_s26 = smov [#allocation8]  }
   0x7   :  { %s46_s25 = sshll.u32 %s1193_s24, 4  ;;  %s65_s27 = sshll.u32 %s1194_s26, 4  ;;  %s47_s25 = int_to_ptr.vmem [resolvable:$true] %s46_s25  ;;  %s66_s27 = int_to_ptr.vmem [resolvable:$true] %s65_s27 }
   0x8   :  { %s1073_s28 = scalar_lea.vmem %s47_s25, 16  ;;  %s1077_s29 = scalar_lea.vmem %s47_s25, 32 }
   0x9   :  { %p1074_p0 = scmp.ne.s32.totalorder %s47_s25, %s1073_s28  ;;  %p1078_p1 = scmp.lt.s32.totalorder %s47_s25, %s47_s25 }
   0xa   :  { %p1079_p2 = scmp.lt.s32.totalorder %s1077_s29, %s1073_s28 }
   0xc   :  { %p1080_p3 = por %p1079_p2, %p1078_p1 }
   0xe   :  { %p1081_p4 = pnand %p1080_p3, %p1074_p0 }
  0x10   :  { %1084 = shalt.err (!%p1081_p4)
}
  0x11   :  { %49 = dma.hbm_to_vmem [thread:$0]  %s1462_s3, 16, %s47_s25, [#allocation6]  }
  0x12   :  { %s1093_s18 = scalar_lea.vmem %s66_s27, 256  ;;  %p1098_p6 = scmp.lt.s32.totalorder %s66_s27, %s66_s27 }
  0x13   :  { %p1094_p5 = scmp.ne.s32.totalorder %s66_s27, %s1093_s18  ;;  %p1099_p7 = scmp.lt.s32.totalorder %s1093_s18, %s1093_s18 }
  0x15   :  { %p1100_p8 = por %p1099_p7, %p1098_p6 }
  0x17   :  { %p1101_p9 = pnand %p1100_p8, %p1094_p5 }
  0x19   :  { %1104 = shalt.err (!%p1101_p9)
}
  0x1a   :  { %s1195_s19 = smov 128   ;;  %s1196_s1 = smov 8  }
  0x1b   :  { %71 = dma.hbm_to_vmem [thread:$0]  %s1464_s5, 256, %s66_s27, [#allocation9], %s1195_s19, %s1195_s19, %s1196_s1  }
  0x1c   :  { %s1197_s22 = smov [#allocation2]   ;;  %s1198_s24 = smov [#allocation7]  }
  0x1d   :  { %s36_s23 = sshll.u32 %s1197_s22, 4  ;;  %s56_s26 = sshll.u32 %s1198_s24, 4  ;;  %s37_s23 = int_to_ptr.vmem [resolvable:$true] %s36_s23  ;;  %s57_s26 = int_to_ptr.vmem [resolvable:$true] %s56_s26 }
  0x1e   :  { %s1113_s3 = scalar_lea.vmem %s37_s23, 128  ;;  %p1118_p11 = scmp.lt.s32.totalorder %s37_s23, %s37_s23 }
  0x1f   :  { %p1114_p10 = scmp.ne.s32.totalorder %s37_s23, %s1113_s3  ;;  %p1119_p12 = scmp.lt.s32.totalorder %s1113_s3, %s1113_s3 }
  0x21   :  { %p1120_p13 = por %p1119_p12, %p1118_p11 }
  0x23   :  { %p1121_p0 = pnand %p1120_p13, %p1114_p10 }
  0x25   :  { %1124 = shalt.err (!%p1121_p0)
}
  0x26   :  { %39 = dma.hbm_to_vmem [thread:$0]  %s1461_s2, 128, %s37_s23, [#allocation3]  }
  0x27   :  { %s1133_s29 = scalar_lea.vmem %s57_s26, 16  ;;  %s1137_s5 = scalar_lea.vmem %s57_s26, 32 }
  0x28   :  { %p1134_p1 = scmp.ne.s32.totalorder %s57_s26, %s1133_s29  ;;  %p1138_p2 = scmp.lt.s32.totalorder %s57_s26, %s57_s26 }
  0x29   :  { %p1139_p3 = scmp.lt.s32.totalorder %s1137_s5, %s1133_s29 }
  0x2b   :  { %p1140_p4 = por %p1139_p3, %p1138_p2 }
  0x2d   :  { %p1141_p5 = pnand %p1140_p4, %p1134_p1 }
  0x2f   :  { %1144 = shalt.err (!%p1141_p5)
}
  0x30   :  { %59 = dma.hbm_to_vmem [thread:$0]  %s1463_s4, 16, %s57_s26, [#allocation6]  }
  0x31   :  { %s1199_s30 = smov [#allocation10]  }
  0x32   :  { %s78_s18 = sshll.u32 %s1199_s30, 4  ;;  %s79_s18 = int_to_ptr.vmem [resolvable:$true] %s78_s18 }
  0x33   :  { %s1153_s19 = scalar_lea.vmem %s79_s18, 16  ;;  %s1157_s1 = scalar_lea.vmem %s79_s18, 32 }
  0x34   :  { %p1154_p6 = scmp.ne.s32.totalorder %s79_s18, %s1153_s19  ;;  %p1158_p7 = scmp.lt.s32.totalorder %s79_s18, %s79_s18 }
  0x35   :  { %p1159_p8 = scmp.lt.s32.totalorder %s1157_s1, %s1153_s19 }
  0x37   :  { %p1160_p9 = por %p1159_p8, %p1158_p7 }
  0x39   :  { %p1161_p10 = pnand %p1160_p9, %p1154_p6 }
  0x3b   :  { %1164 = shalt.err (!%p1161_p10)
}
  0x3c   :  { %81 = dma.hbm_to_vmem [thread:$0]  %s1465_s6, 16, %s79_s18, [#allocation9]  }
  0x3d   :  { %1185 = dma.done.wait [#allocation3], 128  }
  0x3e   :  { %1186 = vsyncadd [#allocation3], 4294967168 }
  0x3f   :  { %1187 = dma.done.wait [#allocation6], 32  }
  0x40   :  { %1188 = vsyncadd [#allocation6], 4294967264 }
  0x41   :  { %1189 = dma.done.wait [#allocation9], 272  }
  0x42   :  { %1190 = vsyncadd [#allocation9], 4294967024  ;;  %v1200_v0 = vmov 0   ;;  %vm147_vm0 = vcmask 1041408   ;;  %v1201_v1 = vmov 0.0   ;;  %s1481_s22 = sld [smem:[#allocation16_spill]]  ;;  %v119_v11 = vlaneseq }
  0x43   :  { %1052 = vset.pattern.permute.xlu0 %v1200_v0  ;;  %1007 = vmatprep.subr.mxu1 %v1201_v1  ;;  %s1482_s26 = sld [smem:[#allocation17_spill]]  ;;  %vm140_vm1 = vcmask 408576   ;;  %s1202_s4 = smov 116   ;;  %v282_v48 = vld [vmem:[#allocation2] sm:$0xff]  ;;  %vm285_vm8 = vcmask 97280   ;;  %vm306_vm9 = vcmask 1041409  }
  0x44   :  { %v120_v12 = vand.u32 127, %v119_v11  ;;  %s1203_s21 = smov 104   ;;  %s1205_s23 = smov 80   ;;  %v1347_v22 = vshrl.u32 %v119_v11, 7  ;;  %vm309_vm10 = vcmask 91136   ;;  %vm373_vm11 = vcmask 1043456  }
  0x45   :  { %vm1206_vm12 = vmmov 0   ;;  %vm495_vm15 = vcmask 93184  }
  0x46   :  { %vm238_vm4 = vcmp.lt.s32.totalorder %v1347_v22, 7  ;;  %vm251_vm5 = vcmp.lt.s32.totalorder %v1347_v22, 6  ;;  %vm264_vm6 = vcmp.lt.s32.totalorder %v1347_v22, 5  ;;  %vm277_vm7 = vcmp.lt.s32.totalorder %v1347_v22, 4  ;;  %1011 = vmatprep.mubr.msk.f32.mxu1 %vm1206_vm12, %v1201_v1 }
  0x48   :  { %v117_v2 = vld [vmem:[%s1481_s22] sm:$0xff]  ;;  %v118_v5 = vld [vmem:[%s1481_s22 + $0x8] sm:$0xff]  ;;  %s1204_s22 = smov 92  }
  0x49   :  { %v139_v3 = vld [vmem:[%s1482_s26 + $0x30] sm:$0x3]  ;;  %122 = vperm.xlu0 %1052, %v117_v2   ;;  %v138_v4 = vld [vmem:[%s1482_s26 + $0x28] sm:$0xff]  ;;  %v137_v6 = vld [vmem:[%s1482_s26 + $0x20] sm:$0xff] }
  0x4a   :  { %990 = vmatprep.subr.msk.mxu0 %vm147_vm0, %v139_v3  ;;  %v136_v7 = vld [vmem:[%s1482_s26 + $0x18] sm:$0xff]  ;;  %v135_v8 = vld [vmem:[%s1482_s26 + $0x10] sm:$0xff]  ;;  %v134_v9 = vld [vmem:[%s1482_s26 + $0x8] sm:$0xff] }
  0x4b   :  { %991 = vmatpush3.msk.msra.mxu0 %vm147_vm0, %v139_v3  ;;  %v133_v10 = vld [vmem:[%s1482_s26] sm:$0xff] }
  0x4c   :  { %992 = vmatprep.subr.mxu0 %v138_v4 }
  0x4d   :  { %993 = vmatpush3.msra.mxu0 %v138_v4  ;;  %125 = vperm.xlu0 %1052, %v118_v5  }
  0x4e   :  { %994 = vmatprep.subr.mxu0 %v137_v6 }
  0x4f   :  { %995 = vmatpush3.msra.mxu0 %v137_v6 }
  0x50   :  { %996 = vmatprep.subr.mxu0 %v136_v7 }
  0x51   :  { %997 = vmatpush3.msra.mxu0 %v136_v7 }
  0x52   :  { %998 = vmatprep.subr.mxu0 %v135_v8 }
  0x53   :  { %999 = vmatpush3.msra.mxu0 %v135_v8 }
  0x54   :  { %1000 = vmatprep.subr.mxu0 %v134_v9 }
  0x55   :  { %1001 = vmatpush3.msra.mxu0 %v134_v9 }
  0x56   :  { %1002 = vmatprep.subr.mxu0 %v133_v10 }
  0x57   :  { %1003 = vmatpush3.msra.mxu0 %v133_v10 }
  0xc4   :  { %v123_v13 = vpop.permute.xlu0 %122 }
  0xc5   :  { %vm127_vm2 = vcmp.eq.s32.totalorder %v123_v13, %v120_v12 }
  0xc6   :  { %v947_v14 = vsel %vm127_vm2, 1.0, %v1201_v1  ;;  %vm665_vm2 = vcmask 31744  }
  0xc7   :  { %1004 = vmatprep.mubr.msk.f32.mxu0 %vm140_vm1, %v947_v14 }
  0xc8   :  { %v126_v15 = vpop.permute.xlu0 %125 }
  0xc9   :  { %vm128_vm3 = vcmp.eq.s32.totalorder %v126_v15, %v120_v12 }
  0xca   :  { %v948_v16 = vsel %vm128_vm3, 1.0, %v1201_v1 }
  0xcb   :  { %1005 = vmatmul.mubr.msk.f32.vlgmr.msra.gmra.mxu0 %vm140_vm1, %v948_v16 }
 0x18b   :  { %v1006_v17 = vpop.f32.mrf.mxu0 }
 0x18c   :  { %230 = vrot.lane.b32.xlu1 %v1006_v17, %s1202_s4 }
 0x18d   :  { %v217_v18 = vpop.f32.mrf.mxu0 }
 0x18e   :  { %243 = vrot.lane.b32.xlu0 %v217_v18, %s1203_s21 }
 0x190   :  { %245 = vrot.lane.b32.xlu1 %v1006_v17, %s1203_s21  ;;  %s1211_s21 = smov [#allocation11]  }
 0x192   :  { %256 = vrot.lane.b32.xlu0 %v217_v18, %s1204_s22 }
 0x194   :  { %228 = vrot.lane.b32.xlu1 %v217_v18, %s1202_s4 }
 0x196   :  { %269 = vrot.lane.b32.xlu0 %v217_v18, %s1205_s23 }
 0x198   :  { %258 = vrot.lane.b32.xlu1 %v1006_v17, %s1204_s22  ;;  %s936_s22 = sshll.u32 %s1211_s21, 4  ;;  %s937_s22 = int_to_ptr.vmem [resolvable:$true] %s936_s22 }
 0x199   :  { %p1170_p12 = scmp.lt.s32.totalorder %s937_s22, %s937_s22 }
 0x19c   :  { %271 = vrot.lane.b32.xlu1 %v1006_v17, %s1205_s23 }
 0x1fe   :  { %v231_v19 = vpop.permute.xlu1 %230 }
 0x1ff   :  { %v235_v25 = vrot.slane %v231_v19, 1 }
 0x200   :  { %v244_v20 = vpop.permute.xlu0 %243 }
 0x201   :  { %v249_v28 = vrot.slane %v244_v20, 2 }
 0x202   :  { %v246_v21 = vpop.permute.xlu1 %245 }
 0x203   :  { %v250_v26 = vrot.slane %v246_v21, 2 }
 0x204   :  { %v257_v23 = vpop.permute.xlu0 %256 }
 0x205   :  { %v252_v34 = vsel %vm251_vm5, %v249_v28, %v250_v26  ;;  %v253_v35 = vsel %vm251_vm5, %v250_v26, %v249_v28  ;;  %v262_v36 = vrot.slane %v257_v23, 3  ;;  %v362_v23 = vld [vmem:[#allocation8 + $0x8] sm:$0xf]  ;;  %vm928_vm5 = vcmask 35840  }
 0x206   :  { %v229_v24 = vpop.permute.xlu1 %228  ;;  %1008 = vmatpush3.msk.msra.mxu1 %vm373_vm11, %v362_v23 }
 0x207   :  { %v234_v27 = vrot.slane %v229_v24, 1  ;;  %v361_v24 = vld [vmem:[#allocation8] sm:$0xff]  ;;  %1009 = vmatprep.subr.mxu1 %v1201_v1 }
 0x208   :  { %v270_v38 = vpop.permute.xlu0 %269  ;;  %1010 = vmatpush3.msra.mxu1 %v361_v24 }
 0x209   :  { %v239_v29 = vsel %vm238_vm4, %v234_v27, %v235_v25  ;;  %v240_v30 = vsel %vm238_vm4, %v235_v25, %v234_v27  ;;  %v275_v44 = vrot.slane %v270_v38, 4  ;;  %1014 = vmatprep.subr.mxu1 %v1201_v1 }
 0x20a   :  { %v241_v31 = vadd.f32 %v239_v29, %v217_v18  ;;  %v242_v32 = vadd.f32 %v1006_v17, %v240_v30  ;;  %v259_v33 = vpop.permute.xlu1 %258 }
 0x20b   :  { %v263_v37 = vrot.slane %v259_v33, 3  ;;  %v952_v33 = vld [vmem:[#allocation5] ss:$0 sm:$0xff] }
 0x20c   :  { %v254_v39 = vadd.f32 %v252_v34, %v241_v31  ;;  %v255_v40 = vadd.f32 %v253_v35, %v242_v32 }
 0x20d   :  { %v265_v41 = vsel %vm264_vm6, %v262_v36, %v263_v37  ;;  %v266_v42 = vsel %vm264_vm6, %v263_v37, %v262_v36  ;;  %v953_v36 = vld [vmem:[#allocation7] ss:$0 sm:$0xff] }
 0x20e   :  { %v272_v43 = vpop.permute.xlu1 %271  ;;  %v267_v46 = vadd.f32 %v265_v41, %v254_v39  ;;  %v268_v47 = vadd.f32 %v266_v42, %v255_v40  ;;  %v1207_v39 = vmov 1966171168   ;;  %v954_v42 = vld [vmem:[#allocation10] ss:$0 sm:$0xff] }
 0x20f   :  { %v276_v45 = vrot.slane %v272_v43, 4  ;;  %v449_v40 = vunpack.c.l.s4 %v1207_v39 }
 0x211   :  { %v278_v49 = vsel %vm277_vm7, %v275_v44, %v276_v45  ;;  %v279_v50 = vsel %vm277_vm7, %v276_v45, %v275_v44  ;;  %v450_v41 = vunpack.c.0.s8 %v449_v40 }
 0x212   :  { %v280_v51 = vadd.f32 %v278_v49, %v267_v46  ;;  %v281_v52 = vadd.f32 %v279_v50, %v268_v47  ;;  %v1208_v49 = vmov 1983009808  }
 0x213   :  { %v453_v43 = vsub.s32 %v450_v41, %v1347_v22  ;;  %v488_v50 = vunpack.c.l.s4 %v1208_v49 }
 0x214   :  { %v283_v53 = vadd.f32 %v282_v48, %v280_v51  ;;  %v284_v54 = vadd.f32 %v282_v48, %v281_v52  ;;  %v472_v48 = vsub.s32 0, %v1347_v22 }
 0x216   :  { %v286_v55 = vsel %vm285_vm8, %v283_v53, -inf  ;;  %v293_v56 = vsel %vm285_vm8, %v284_v54, -inf }
 0x217   :  { %v287_v57 = vrot.slane %v286_v55, 4  ;;  %v294_v58 = vrot.slane %v293_v56, 4 }
 0x219   :  { %v288_v59 = vmax.f32 %v286_v55, %v287_v57  ;;  %v295_v60 = vmax.f32 %v293_v56, %v294_v58  ;;  %v489_v55 = vunpack.c.0.s8 %v488_v50 }
 0x21b   :  { %v289_v61 = vrot.slane %v288_v59, 2  ;;  %v296_v62 = vrot.slane %v295_v60, 2 }
 0x21d   :  { %v290_v63 = vmax.f32 %v288_v59, %v289_v61  ;;  %v297_v0 = vmax.f32 %v295_v60, %v296_v62  ;;  %v1378_v59 = vsub.s32 %v489_v55, %v1347_v22 }
 0x21f   :  { %v291_v2 = vrot.slane %v290_v63, 1  ;;  %v298_v3 = vrot.slane %v297_v0, 1 }
 0x221   :  { %v292_v4 = vmax.f32 %v290_v63, %v291_v2  ;;  %v299_v5 = vmax.f32 %v297_v0, %v298_v3  ;;  %v1209_v63 = vmov 269488144   ;;  %v1210_v2 = vmov 842150450  }
 0x222   :  { %v502_v0 = vunpack.c.l.s4 %v1209_v63  ;;  %v509_v3 = vunpack.c.l.s4 %v1210_v2 }
 0x223   :  { %v300_v6 = vmax.f32 %v292_v4, 0.0  ;;  %v301_v7 = vmax.f32 %v299_v5, 0.0 }
 0x224   :  { %v503_v4 = vunpack.c.0.s8 %v502_v0  ;;  %v510_v5 = vunpack.c.0.s8 %v509_v3 }
 0x225   :  { %v1356_v8 = vsel %vm306_vm9, %v301_v7, %v300_v6 }
 0x226   :  { %v310_v9 = vsel %vm309_vm10, %v1356_v8, 0.0 }
 0x227   :  { %311 = vadd.xlane.f32.xlu0 %v310_v9 }
 0x2b0   :  { %v312_v10 = vpop.xlane.xlu0 %311 }
 0x2b1   :  { %v314_v11 = vmul.f32 0.083333336, %v312_v10 }
 0x2b3   :  { %v316_v12 = vrot.slane %v314_v11, 1  ;;  %v319_v13 = vsub.f32 %v300_v6, %v314_v11  ;;  %v1385_v6 = vsub.s32 %v503_v4, %v1347_v22  ;;  %v844_v4 = vld [vmem:[%s1474_s15 + $0x8] sm:$0xf] }
 0x2b5   :  { %v320_v14 = vsub.f32 %v301_v7, %v316_v12  ;;  %v321_v17 = vmul.f32 %v319_v13, %v319_v13  ;;  %v1388_v7 = vsub.s32 %v510_v5, %v1347_v22  ;;  %v572_v22 = vld [vmem:[%s1468_s9 + $0x8] sm:$0xf]  ;;  %v843_v5 = vld [vmem:[%s1474_s15] sm:$0xff] }
 0x2b7   :  { %v349_v15 = vrot.slane %v320_v14, 7  ;;  %v322_v16 = vmul.f32 %v320_v14, %v320_v14 }
 0x2b9   :  { %v350_v18 = vsel %vm306_vm9, %v349_v15, %v319_v13  ;;  %v325_v19 = vrot.slane %v322_v16, 7 }
 0x2ba   :  { %v352_v34 = vmul.f32 %v952_v33, %v350_v18 }
 0x2bb   :  { %v326_v20 = vsel %vm306_vm9, %v325_v19, %v321_v17 }
 0x2bc   :  { %v328_v21 = vsel %vm309_vm10, %v326_v20, 0.0  ;;  %v571_v20 = vld [vmem:[%s1468_s9] sm:$0xff] }
 0x2bd   :  { %329 = vadd.xlane.f32.xlu1 %v328_v21 }
 0x346   :  { %v330_v25 = vpop.xlane.xlu1 %329 }
 0x347   :  { %v331_v26 = vmul.f32 0.09090909, %v330_v25 }
 0x349   :  { %1053 = vrsqrt.f32 %v331_v26  ;;  %vm334_vm13 = vcmp.eq.f32.partialorder %v331_v26, inf  ;;  %v337_v29 = vand.u32 2147483648, %v331_v26  ;;  %vm336_vm14 = vcmp.eq.f32.partialorder %v331_v26, 0.0 }
 0x356   :  { %v1054_v27 = vpop.eup %1053 }
 0x357   :  { %v333_v28 = vmul.f32 %v1054_v27, %v331_v26 }
 0x359   :  { %v335_v30 = vsel %vm334_vm13, %v331_v26, %v333_v28 }
 0x35a   :  { %v338_v31 = vsel %vm336_vm14, %v337_v29, %v335_v30 }
 0x35b   :  { %v339_v32 = vadd.f32 1e-06, %v338_v31  ;;  %v957_v31 = vld [vmem:[%s1466_s7] ss:$0 sm:$0xff] }
 0x35d   :  { %1055 = vrcp.f32 %v339_v32 }
 0x36a   :  { %v1056_v35 = vpop.eup %1055 }
 0x36b   :  { %v353_v37 = vmul.f32 %v1056_v35, %v352_v34  ;;  %v958_v34 = vld [vmem:[%s1467_s8] ss:$0 sm:$0xff] }
 0x36d   :  { %v360_v38 = vadd.f32 %v953_v36, %v353_v37  ;;  %v657_v37 = vld [vmem:[%s1470_s11] sm:$0xf] }
 0x36f   :  { %1012 = vmatmul.mubr.msk.f32.vlgmr.msra.gmra.mxu1 %vm285_vm8, %v360_v38  ;;  %v959_v38 = vld [vmem:[%s1469_s10] ss:$0 sm:$0xff] }
 0x370   :  { %1018 = vmatprep.mubr.msk.f32.mxu1 %vm1206_vm12, %v1201_v1  ;;  %1015 = vmatpush3.msk.msra.mxu1 %vm373_vm11, %v572_v22  ;;  %v967_v22 = vld [vmem:[%s1475_s16] ss:$0 sm:$0xff] }
 0x371   :  { %1016 = vmatprep.subr.mxu1 %v1201_v1 }
 0x372   :  { %1017 = vmatpush3.msra.mxu1 %v571_v20 }
 0x373   :  { %1021 = vmatprep.subr.mxu1 %v1201_v1 }
 0x42f   :  { %v443_v44 = vpop.f32.mrf.mxu1 }
 0x430   :  { %v444_v45 = vadd.f32 %v954_v42, %v443_v44 }
 0x431   :  { %v1013_v46 = vpop.f32.mrf.mxu1 }
 0x432   :  { %v454_v47 = vrot.slane %v444_v45, %v453_v43 }
 0x434   :  { %v455_v51 = vcombine.high %v454_v47, %v454_v47  ;;  %v462_v52 = vrot.slane %v454_v47, %v453_v43 }
 0x436   :  { %v469_v53 = vrot.slane %v455_v51, %v453_v43  ;;  %v473_v54 = vrot.slane %v462_v52, %v472_v48  ;;  %v962_v43 = vld [vmem:[%s1471_s12] ss:$0 sm:$0xff] }
 0x438   :  { %v477_v56 = vrot.slane %v469_v53, %v472_v48  ;;  %v1372_v57 = vadd.f32 %v473_v54, %v1356_v8 }
 0x43a   :  { %v1375_v58 = vadd.f32 %v477_v56, %v1356_v8 }
 0x43c   :  { %v486_v60 = vcombine.low %v1372_v57, %v1375_v58 }
 0x43e   :  { %v493_v61 = vrot.slane %v486_v60, %v1378_v59 }
 0x440   :  { %v496_v62 = vsel %vm495_vm15, %v493_v61, 0.0 }
 0x441   :  { %497 = vadd.xlane.f32.xlu0 %v496_v62 }
 0x4ca   :  { %v498_v8 = vpop.xlane.xlu0 %497 }
 0x4cb   :  { %v499_v9 = vmul.f32 0.083333336, %v498_v8 }
 0x4cd   :  { %v507_v10 = vrot.slane %v499_v9, %v1385_v6  ;;  %v514_v11 = vrot.slane %v499_v9, %v1388_v7 }
 0x4cf   :  { %v517_v12 = vsub.f32 %v1372_v57, %v507_v10  ;;  %v518_v13 = vsub.f32 %v1375_v58, %v514_v11 }
 0x4d1   :  { %v553_v14 = vcombine.low %v517_v12, %v518_v13  ;;  %v519_v15 = vmul.f32 %v517_v12, %v517_v12  ;;  %v520_v16 = vmul.f32 %v518_v13, %v518_v13 }
 0x4d3   :  { %v523_v17 = vcombine.low %v519_v15, %v520_v16  ;;  %v560_v30 = vrot.slane %v553_v14, %v1378_v59  ;;  %v965_v15 = vld [vmem:[%s1472_s13] ss:$0 sm:$0xff]  ;;  %s1165_s13 = scalar_lea.vmem %s937_s22, 64 }
 0x4d4   :  { %p1166_p11 = scmp.ne.s32.totalorder %s937_s22, %s1165_s13  ;;  %p1171_p13 = scmp.lt.s32.totalorder %s1165_s13, %s1165_s13 }
 0x4d5   :  { %v530_v18 = vrot.slane %v523_v17, %v1378_v59  ;;  %v562_v32 = vmul.f32 %v957_v31, %v560_v30  ;;  %v966_v17 = vld [vmem:[%s1473_s14] ss:$0 sm:$0xff] }
 0x4d6   :  { %p1172_p0 = por %p1171_p13, %p1170_p12 }
 0x4d7   :  { %v532_v19 = vsel %vm495_vm15, %v530_v18, 0.0 }
 0x4d8   :  { %533 = vadd.xlane.f32.xlu0 %v532_v19  ;;  %p1173_p1 = pnand %p1172_p0, %p1166_p11 }
 0x561   :  { %v534_v21 = vpop.xlane.xlu0 %533 }
 0x562   :  { %v535_v23 = vmul.f32 0.09090909, %v534_v21 }
 0x564   :  { %1057 = vrsqrt.f32 %v535_v23  ;;  %vm538_vm0 = vcmp.eq.f32.partialorder %v535_v23, inf  ;;  %v541_v26 = vand.u32 2147483648, %v535_v23  ;;  %vm540_vm1 = vcmp.eq.f32.partialorder %v535_v23, 0.0 }
 0x571   :  { %v1058_v24 = vpop.eup %1057 }
 0x572   :  { %v537_v25 = vmul.f32 %v1058_v24, %v535_v23 }
 0x574   :  { %v539_v27 = vsel %vm538_vm0, %v535_v23, %v537_v25 }
 0x575   :  { %v542_v28 = vsel %vm540_vm1, %v541_v26, %v539_v27 }
 0x576   :  { %v543_v29 = vadd.f32 1e-06, %v542_v28 }
 0x578   :  { %1059 = vrcp.f32 %v543_v29 }
 0x585   :  { %v1060_v33 = vpop.eup %1059 }
 0x586   :  { %v563_v35 = vmul.f32 %v1060_v33, %v562_v32 }
 0x588   :  { %v570_v36 = vadd.f32 %v958_v34, %v563_v35 }
 0x58a   :  { %1019 = vmatmul.mubr.msk.f32.vlgmr.msra.gmra.mxu1 %vm285_vm8, %v570_v36 }
 0x58b   :  { %1023 = vmatprep.mubr.msk.f32.mxu1 %vm1206_vm12, %v1201_v1  ;;  %1022 = vmatpush3.msk.msra.mxu1 %vm373_vm11, %v657_v37 }
 0x58c   :  { %1026 = vmatprep.subr.mxu1 %v1201_v1 }
 0x64a   :  { %v652_v39 = vpop.f32.mrf.mxu1 }
 0x64b   :  { %v653_v40 = vadd.f32 %v959_v38, %v652_v39 }
 0x64c   :  { %v1020_v41 = vpop.f32.mrf.mxu1 }
 0x64d   :  { %v656_v42 = vmax.f32 %v653_v40, 0.0 }
 0x64f   :  { %1024 = vmatmul.mubr.msk.f32.vlgmr.msra.gmra.mxu1 %vm665_vm2, %v656_v42 }
 0x650   :  { %1030 = vmatprep.mubr.msk.f32.mxu1 %vm1206_vm12, %v1201_v1  ;;  %1027 = vmatpush3.msk.msra.mxu1 %vm373_vm11, %v844_v4 }
 0x651   :  { %1028 = vmatprep.subr.mxu1 %v1201_v1 }
 0x652   :  { %1029 = vmatpush3.msra.mxu1 %v843_v5 }
 0x70f   :  { %v738_v44 = vpop.f32.mrf.mxu1 }
 0x710   :  { %v739_v45 = vadd.f32 %v962_v43, %v738_v44 }
 0x711   :  { %v1025_v46 = vpop.f32.mrf.mxu1 }
 0x712   :  { %v749_v47 = vrot.slane %v739_v45, %v1378_v59 }
 0x714   :  { %v750_v48 = vcombine.high %v749_v47, %v749_v47  ;;  %v753_v49 = vadd.f32 %v749_v47, %v1372_v57 }
 0x716   :  { %v754_v50 = vadd.f32 %v750_v48, %v1375_v58 }
 0x718   :  { %v759_v51 = vcombine.low %v753_v49, %v754_v50 }
 0x71a   :  { %v766_v52 = vrot.slane %v759_v51, %v1378_v59 }
 0x71c   :  { %v768_v53 = vsel %vm495_vm15, %v766_v52, 0.0 }
 0x71d   :  { %769 = vadd.xlane.f32.xlu1 %v768_v53 }
 0x7a6   :  { %v770_v54 = vpop.xlane.xlu1 %769 }
 0x7a7   :  { %v771_v55 = vmul.f32 0.083333336, %v770_v54 }
 0x7a9   :  { %v779_v56 = vrot.slane %v771_v55, %v1385_v6  ;;  %v786_v60 = vrot.slane %v771_v55, %v1388_v7 }
 0x7ab   :  { %v789_v61 = vsub.f32 %v753_v49, %v779_v56  ;;  %v790_v62 = vsub.f32 %v754_v50, %v786_v60 }
 0x7ad   :  { %v791_v63 = vmul.f32 %v789_v61, %v789_v61  ;;  %v792_v0 = vmul.f32 %v790_v62, %v790_v62  ;;  %v825_v2 = vcombine.low %v789_v61, %v790_v62 }
 0x7af   :  { %v795_v57 = vcombine.low %v791_v63, %v792_v0  ;;  %v832_v14 = vrot.slane %v825_v2, %v1378_v59 }
 0x7b1   :  { %v802_v58 = vrot.slane %v795_v57, %v1378_v59  ;;  %v834_v1 = vmul.f32 %v965_v15, %v832_v14 }
 0x7b3   :  { %v804_v3 = vsel %vm495_vm15, %v802_v58, 0.0 }
 0x7b4   :  { %805 = vadd.xlane.f32.xlu0 %v804_v3 }
 0x83d   :  { %v806_v6 = vpop.xlane.xlu0 %805 }
 0x83e   :  { %v807_v7 = vmul.f32 0.09090909, %v806_v6 }
 0x840   :  { %1061 = vrsqrt.f32 %v807_v7  ;;  %vm810_vm3 = vcmp.eq.f32.partialorder %v807_v7, inf  ;;  %v813_v10 = vand.u32 2147483648, %v807_v7  ;;  %vm812_vm4 = vcmp.eq.f32.partialorder %v807_v7, 0.0 }
 0x84d   :  { %v1062_v8 = vpop.eup %1061 }
 0x84e   :  { %v809_v9 = vmul.f32 %v1062_v8, %v807_v7 }
 0x850   :  { %v811_v11 = vsel %vm810_vm3, %v807_v7, %v809_v9 }
 0x851   :  { %v814_v12 = vsel %vm812_vm4, %v813_v10, %v811_v11 }
 0x852   :  { %v815_v13 = vadd.f32 1e-06, %v814_v12 }
 0x854   :  { %1063 = vrcp.f32 %v815_v13 }
 0x861   :  { %v1064_v16 = vpop.eup %1063 }
 0x862   :  { %v835_v18 = vmul.f32 %v1064_v16, %v834_v1 }
 0x864   :  { %v842_v19 = vadd.f32 %v966_v17, %v835_v18 }
 0x866   :  { %1031 = vmatmul.mubr.msk.f32.vlgmr.msra.gmra.mxu1 %vm285_vm8, %v842_v19 }
 0x926   :  { %v924_v59 = vpop.f32.mrf.mxu1 }
 0x927   :  { %v925_v20 = vadd.f32 %v967_v22, %v924_v59 }
 0x928   :  { %v1032_v21 = vpop.f32.mrf.mxu1 }
 0x929   :  { %929 = vst.msk [vmem:[#allocation11] sm:$0xf] %vm928_vm5, %v925_v20 }
 0x92a   :  { %1176 = shalt.err (!%p1173_p1)
}
 0x92b   :  { %939 = dma.vmem_to_hbm [thread:$0]  %s937_s22, 64, %s1476_s17, [#allocation4]  }
 0x92c   :  { %1191 = dma.done.wait [#allocation4], 64  }
 0x92d   :  { %1192 = vsyncadd [#allocation4], 4294967232 }
 0x92e   :  { %943 = vsyncpa [#allocation3], 1 }
 0x92f   :  { %944 = vsyncpa [#allocation6], 1 }
 0x930   :  { %945 = vsyncpa [#allocation9], 1 }
 0x931   :  { %946 = vsyncpa [#allocation4], 1 }

</bundles_post_ra>
